<compile_context>
chip_gen: v6e
topology: v6e:2x2x1
jax: 0.10.0
libtpu: 0.0.40
codegen_flags: <defaults>
</compile_context>

<pallas_src>
import functools

import jax
import jax.numpy as jnp
import numpy as np
from jax import lax
from jax.experimental import pallas as pl
from jax.experimental.pallas import tpu as pltpu

# ----- cfg flags (exercise every branch of the reference module) -------------
RESIDUAL_ATT = True
NORMALISE_DOT = True
POSITION_ENCODER = True
MAX_SCORE_CHANNEL = True
_EPS = 1e-12  # torch.nn.functional.normalize default eps

# 48 MiB: above the default scoped VMEM on all generations (16/32 MiB), safely
# below v7x's 64 MiB physical VMEM, and far above this kernel's per-step need
# (~TQ*HW*6B + D*HW*12B at the default tile sizes).
_VMEM_LIMIT_BYTES = 48 * 1024 * 1024


def _qkv_warp_kernel(x0_ref, x1_ref, wq_ref, wk_ref, wv_ref, aux_ref, out_ref,
                     *, d, compute_dtype, approx_recip):
    """One grid step == (batch element, query tile).  Channels-first layout.

    x0_ref : (1, D, TQ)  query-pixel tile of vol0
    x1_ref : (1, D, HW)  full vol1 (stays resident across the query tiles of b)
    w*_ref : (D, D)      1x1-conv weights, (out, in)
    aux_ref: (Na, HW)    rows = [u ; v ;] ones  (pos grid + softmax-denominator)
    out_ref: (1, C, TQ)  C = 2D (+2 pos) (+1 max score), lane-dense store
    """
    f32 = jnp.float32
    x0 = x0_ref[0]                                    # (D, TQ)
    x1 = x1_ref[0]                                    # (D, HW)

    # ---- 1x1 convolutions == per-pixel matmuls on the MXU -------------------
    q = jnp.dot(wq_ref[...], x0, preferred_element_type=f32)    # (D, TQ)
    v0 = jnp.dot(wv_ref[...], x0, preferred_element_type=f32)   # (D, TQ)
    k = jnp.dot(wk_ref[...], x1, preferred_element_type=f32)    # (D, HW)
    v1 = jnp.dot(wv_ref[...], x1, preferred_element_type=f32)   # (D, HW)

    if RESIDUAL_ATT:
        q = q + x0
        v0 = v0 + x0
        k = k + x1
        v1 = v1 + x1

    if NORMALISE_DOT:
        # torch F.normalize: x / max(||x||, eps) == x * rsqrt(max(||x||^2, eps^2))
        q = q * lax.rsqrt(jnp.maximum(jnp.sum(q * q, axis=0, keepdims=True),
                                      _EPS * _EPS))
        k = k * lax.rsqrt(jnp.maximum(jnp.sum(k * k, axis=0, keepdims=True),
                                      _EPS * _EPS))

    # ---- correlation scores + numerically-stable softmax (query tile) -------
    qt = jnp.transpose(q).astype(compute_dtype)                  # (TQ, D) tiny
    s = jnp.dot(qt, k.astype(compute_dtype),
                preferred_element_type=f32)                      # (TQ, HW) f32
    s = s - jnp.max(s, axis=-1, keepdims=True)
    p = jnp.exp(s)                      # unnormalised attention; row max == 1

    # ---- fused  [v1 ; grid ; ones] @ att^T  ----------------------------------
    rhs = jnp.concatenate([v1.astype(compute_dtype),
                           aux_ref[...].astype(compute_dtype)], axis=0)
    res = lax.dot_general(rhs, p.astype(compute_dtype),
                          (((1,), (1,)), ((), ())),
                          preferred_element_type=f32)            # (D+Na, TQ)

    n_pos = 2 if POSITION_ENCODER else 0
    denom = res[d + n_pos:d + n_pos + 1, :]                      # (1, TQ) sum exp
    inv = pl.reciprocal(denom, approx=approx_recip)              # (1, TQ)

    pieces = [v0, res[:d + n_pos, :] * inv]          # [v0 | v1_warped | pos]
    if MAX_SCORE_CHANNEL:
        pieces.append(inv)          # max_j softmax == 1/denom (row max of p is 1)
    out_ref[0] = jnp.concatenate(pieces, axis=0).astype(out_ref.dtype)


def _pick_block_q(hw, target):
    """Largest multiple of 128 that divides HW and is <= target, else HW."""
    if hw <= max(target, 128):
        return hw
    bq = (min(target, hw) // 128) * 128
    while bq >= 128:
        if hw % bq == 0:
            return bq
        bq -= 128
    return hw


def correlation_volume_warping_qkv(vol0, vol1, wq, wk, wv, *,
                                   block_q=256,
                                   compute_dtype=jnp.bfloat16):
    """vol0/vol1: (B, D, H, W) f32 NCHW.  wq/wk/wv: (D, D) 1x1-conv weights
    (out, in).  Returns (B, 2D+2+1, H, W), matching the PyTorch module."""
    B, D, H, W = vol0.shape
    HW = H * W
    x0 = vol0.reshape(B, D, HW)          # free reshape, stays channels-first
    x1 = vol1.reshape(B, D, HW)

    # aux rows: optional positional grid + a row of ones (softmax denominator).
    rows = []
    if POSITION_ENCODER:
        u = jnp.linspace(-1.0, 1.0, H, dtype=jnp.float32)
        v = jnp.linspace(-1.0, 1.0, W, dtype=jnp.float32)
        uu, vv = jnp.meshgrid(u, v, indexing="ij")   # torch.meshgrid default 'ij'
        rows += [uu.reshape(1, HW), vv.reshape(1, HW)]
    rows.append(jnp.ones((1, HW), jnp.float32))
    aux = jnp.concatenate(rows, axis=0)              # (Na, HW)
    na = aux.shape[0]

    tq = _pick_block_q(HW, block_q)
    n_qt = HW // tq
    c_out = 2 * D + (2 if POSITION_ENCODER else 0) + (1 if MAX_SCORE_CHANNEL else 0)

    kernel = functools.partial(
        _qkv_warp_kernel, d=D, compute_dtype=compute_dtype,
        approx_recip=(compute_dtype != jnp.float32))

    out = pl.pallas_call(
        kernel,
        out_shape=jax.ShapeDtypeStruct((B, c_out, HW), jnp.float32),
        grid=(B, n_qt),
        in_specs=[
            pl.BlockSpec((1, D, tq), lambda b, t: (b, 0, t)),   # x0 query tile
            pl.BlockSpec((1, D, HW), lambda b, t: (b, 0, 0)),   # x1 (resident per b)
            pl.BlockSpec((D, D), lambda b, t: (0, 0)),          # wq
            pl.BlockSpec((D, D), lambda b, t: (0, 0)),          # wk
            pl.BlockSpec((D, D), lambda b, t: (0, 0)),          # wv
            pl.BlockSpec((na, HW), lambda b, t: (0, 0)),        # [u; v; ones]
        ],
        out_specs=pl.BlockSpec((1, c_out, tq), lambda b, t: (b, 0, t)),
        compiler_params=pltpu.CompilerParams(
            dimension_semantics=("parallel", "parallel"),
            vmem_limit_bytes=_VMEM_LIMIT_BYTES),
    )(x0, x1,
      wq.astype(jnp.float32), wk.astype(jnp.float32), wv.astype(jnp.float32),
      aux)

    return out.reshape(B, c_out, H, W)   # already channels-first: free reshape


# ----------------------- pure-JAX reference (for checking) -------------------
def _reference(vol0, vol1, wq, wk, wv):
    B, D, H, W = vol0.shape
    HW = H * W
    conv = lambda x, w: jnp.einsum("oi,bihw->bohw", w, x)
    q = conv(vol0, wq)
    k = conv(vol1, wk)
    v0 = conv(vol0, wv)
    v1 = conv(vol1, wv)
    if RESIDUAL_ATT:
        q, k, v0, v1 = q + vol0, k + vol1, v0 + vol0, v1 + vol1
    q = q.reshape(B, D, HW)
    k = k.reshape(B, D, HW)
    v0 = v0.reshape(B, D, HW)
    v1 = v1.reshape(B, D, HW)
    if NORMALISE_DOT:
        q = q / jnp.maximum(jnp.linalg.norm(q, axis=1, keepdims=True), _EPS)
        k = k / jnp.maximum(jnp.linalg.norm(k, axis=1, keepdims=True), _EPS)
    cv = jnp.einsum("bdi,bdj->bij", q, k)
    cv = jax.nn.softmax(cv, axis=2)
    v1w = jnp.einsum("bdj,bij->bdi", v1, cv)
    cats = [v0, v1w]
    if POSITION_ENCODER:
        u = jnp.linspace(-1.0, 1.0, H)
        v = jnp.linspace(-1.0, 1.0, W)
        uu, vv = jnp.meshgrid(u, v, indexing="ij")
        grid = jnp.stack([uu, vv], axis=0).reshape(2, HW)
        cats.append(jnp.einsum("cj,bij->bci", grid, cv))
    if MAX_SCORE_CHANNEL:
        cats.append(jnp.max(cv, axis=2, keepdims=True).transpose(0, 2, 1))
    return jnp.concatenate(cats, axis=1).reshape(B, -1, H, W)


if __name__ == "__main__":
    def _run_case(B, D, H, W, *, block_q, compute_dtype, rtol, atol, seed):
        key = jax.random.PRNGKey(seed)
        k0, k1, kq, kk, kv = jax.random.split(key, 5)
        vol0 = jax.random.normal(k0, (B, D, H, W), dtype=jnp.float32)
        vol1 = jax.random.normal(k1, (B, D, H, W), dtype=jnp.float32)
        bound = 1.0 / np.sqrt(D)
        wq = jax.random.uniform(kq, (D, D), jnp.float32, -bound, bound)
        wk = jax.random.uniform(kk, (D, D), jnp.float32, -bound, bound)
        wv = jax.random.uniform(kv, (D, D), jnp.float32, -bound, bound)

        out = jax.block_until_ready(
            correlation_volume_warping_qkv(vol0, vol1, wq, wk, wv,
                                           block_q=block_q,
                                           compute_dtype=compute_dtype))
        ref = jax.block_until_ready(_reference(vol0, vol1, wq, wk, wv))
        assert out.shape == (B, 2 * D + 3, H, W), out.shape
        np.testing.assert_allclose(np.asarray(out), np.asarray(ref),
                                   rtol=rtol, atol=atol)

    # f32 compute path, two query tiles per batch element -> tight tolerance.
    _run_case(2, 4, 16, 16, block_q=128, compute_dtype=jnp.float32,
              rtol=2e-4, atol=2e-5, seed=0)
    # bf16-MXU fast path (f32 accumulation / softmax stats) -> loose tolerance.
    _run_case(2, 4, 16, 16, block_q=256, compute_dtype=jnp.bfloat16,
              rtol=5e-2, atol=2e-2, seed=0)
    # different D / aspect ratio, single query tile.
    _run_case(1, 8, 8, 16, block_q=256, compute_dtype=jnp.float32,
              rtol=2e-4, atol=2e-5, seed=1)

    print("KERNEL_OK")
</pallas_src>

<mosaic_0001>
module attributes {stable_mosaic.version = 11 : i64} {
  func.func @_qkv_warp_kernel(%arg0: i32, %arg1: i32, %arg2: memref<1x4x128xf32, #tpu.memory_space<vmem>>, %arg3: memref<1x4x256xf32, #tpu.memory_space<vmem>>, %arg4: memref<4x4xf32, #tpu.memory_space<vmem>>, %arg5: memref<4x4xf32, #tpu.memory_space<vmem>>, %arg6: memref<4x4xf32, #tpu.memory_space<vmem>>, %arg7: memref<3x256xf32, #tpu.memory_space<vmem>>, %arg8: memref<1x11x128xf32, #tpu.memory_space<vmem>>) attributes {dimension_semantics = [#tpu.dimension_semantics<parallel>, #tpu.dimension_semantics<parallel>], iteration_bounds = array<i64: 2, 2>, scalar_prefetch = 0 : i64, scratch_operands = 0 : i64, tpu.core_type = #tpu.core_type<tc>, window_params = [{transform_indices = @transform_0, window_bounds = array<i64: 1, 4, 128>}, {transform_indices = @transform_1, window_bounds = array<i64: 1, 4, 256>}, {pipeline_mode = #tpu.pipeline_mode<synchronous>, transform_indices = @transform_2, window_bounds = array<i64: 4, 4>}, {pipeline_mode = #tpu.pipeline_mode<synchronous>, transform_indices = @transform_3, window_bounds = array<i64: 4, 4>}, {pipeline_mode = #tpu.pipeline_mode<synchronous>, transform_indices = @transform_4, window_bounds = array<i64: 4, 4>}, {pipeline_mode = #tpu.pipeline_mode<synchronous>, transform_indices = @transform_5, window_bounds = array<i64: 3, 256>}, {transform_indices = @transform_6, window_bounds = array<i64: 1, 11, 128>}]} {
    %c0 = arith.constant 0 : index
    %c0_0 = arith.constant 0 : index
    %c0_1 = arith.constant 0 : index
    %0 = vector.load %arg2[%c0, %c0_0, %c0_1] : memref<1x4x128xf32, #tpu.memory_space<vmem>>, vector<1x4x128xf32>
    %1 = vector.shape_cast %0 : vector<1x4x128xf32> to vector<4x128xf32>
    %c0_2 = arith.constant 0 : index
    %c0_3 = arith.constant 0 : index
    %c0_4 = arith.constant 0 : index
    %2 = vector.load %arg3[%c0_2, %c0_3, %c0_4] : memref<1x4x256xf32, #tpu.memory_space<vmem>>, vector<1x4x256xf32>
    %3 = vector.shape_cast %2 : vector<1x4x256xf32> to vector<4x256xf32>
    %c0_5 = arith.constant 0 : index
    %c0_6 = arith.constant 0 : index
    %4 = vector.load %arg4[%c0_5, %c0_6] : memref<4x4xf32, #tpu.memory_space<vmem>>, vector<4x4xf32>
    %cst = arith.constant dense<0.000000e+00> : vector<4x128xf32>
    %5 = tpu.matmul %4, %1, %cst {dimension_numbers = #tpu.dot_dimension_numbers<[1], [0], [0], [1], [0, 0, 1, 1], [], []>} : vector<4x4xf32>, vector<4x128xf32>, vector<4x128xf32> -> vector<4x128xf32>
    %c0_7 = arith.constant 0 : index
    %c0_8 = arith.constant 0 : index
    %6 = vector.load %arg6[%c0_7, %c0_8] : memref<4x4xf32, #tpu.memory_space<vmem>>, vector<4x4xf32>
    %cst_9 = arith.constant dense<0.000000e+00> : vector<4x128xf32>
    %7 = tpu.matmul %6, %1, %cst_9 {dimension_numbers = #tpu.dot_dimension_numbers<[1], [0], [0], [1], [0, 0, 1, 1], [], []>} : vector<4x4xf32>, vector<4x128xf32>, vector<4x128xf32> -> vector<4x128xf32>
    %c0_10 = arith.constant 0 : index
    %c0_11 = arith.constant 0 : index
    %8 = vector.load %arg5[%c0_10, %c0_11] : memref<4x4xf32, #tpu.memory_space<vmem>>, vector<4x4xf32>
    %cst_12 = arith.constant dense<0.000000e+00> : vector<4x256xf32>
    %9 = tpu.matmul %8, %3, %cst_12 {dimension_numbers = #tpu.dot_dimension_numbers<[1], [0], [0], [1], [0, 0, 1, 1], [], []>} : vector<4x4xf32>, vector<4x256xf32>, vector<4x256xf32> -> vector<4x256xf32>
    %c0_13 = arith.constant 0 : index
    %c0_14 = arith.constant 0 : index
    %10 = vector.load %arg6[%c0_13, %c0_14] : memref<4x4xf32, #tpu.memory_space<vmem>>, vector<4x4xf32>
    %cst_15 = arith.constant dense<0.000000e+00> : vector<4x256xf32>
    %11 = tpu.matmul %10, %3, %cst_15 {dimension_numbers = #tpu.dot_dimension_numbers<[1], [0], [0], [1], [0, 0, 1, 1], [], []>} : vector<4x4xf32>, vector<4x256xf32>, vector<4x256xf32> -> vector<4x256xf32>
    %12 = arith.addf %5, %1 : vector<4x128xf32>
    %13 = arith.addf %7, %1 : vector<4x128xf32>
    %14 = arith.addf %9, %3 : vector<4x256xf32>
    %15 = arith.addf %11, %3 : vector<4x256xf32>
    %16 = arith.mulf %12, %12 : vector<4x128xf32>
    %cst_16 = arith.constant dense<0.000000e+00> : vector<128xf32>
    %17 = vector.multi_reduction <add>, %16, %cst_16 [0] : vector<4x128xf32> to vector<128xf32>
    %18 = vector.shape_cast %17 : vector<128xf32> to vector<1x128xf32>
    %cst_17 = arith.constant 1.000000e-24 : f32
    %19 = vector.broadcast %cst_17 : f32 to vector<1x128xf32>
    %20 = arith.maximumf %18, %19 : vector<1x128xf32>
    %21 = math.rsqrt %20 : vector<1x128xf32>
    %22 = vector.broadcast %21 : vector<1x128xf32> to vector<4x128xf32>
    %23 = arith.mulf %12, %22 : vector<4x128xf32>
    %24 = arith.mulf %14, %14 : vector<4x256xf32>
    %cst_18 = arith.constant dense<0.000000e+00> : vector<256xf32>
    %25 = vector.multi_reduction <add>, %24, %cst_18 [0] : vector<4x256xf32> to vector<256xf32>
    %26 = vector.shape_cast %25 : vector<256xf32> to vector<1x256xf32>
    %cst_19 = arith.constant 1.000000e-24 : f32
    %27 = vector.broadcast %cst_19 : f32 to vector<1x256xf32>
    %28 = arith.maximumf %26, %27 : vector<1x256xf32>
    %29 = math.rsqrt %28 : vector<1x256xf32>
    %30 = vector.broadcast %29 : vector<1x256xf32> to vector<4x256xf32>
    %31 = arith.mulf %14, %30 : vector<4x256xf32>
    %32 = tpu.transpose %23, [1, 0] : vector<4x128xf32> -> vector<128x4xf32>
    %cst_20 = arith.constant dense<0.000000e+00> : vector<128x256xf32>
    %33 = tpu.matmul %32, %31, %cst_20 {dimension_numbers = #tpu.dot_dimension_numbers<[1], [0], [0], [1], [0, 0, 1, 1], [], []>} : vector<128x4xf32>, vector<4x256xf32>, vector<128x256xf32> -> vector<128x256xf32>
    %cst_21 = arith.constant dense<0xFF800000> : vector<128xf32>
    %34 = vector.multi_reduction <maximumf>, %33, %cst_21 [1] : vector<128x256xf32> to vector<128xf32>
    %35 = vector.shape_cast %34 : vector<128xf32> to vector<128x1xf32>
    %36 = vector.broadcast %35 : vector<128x1xf32> to vector<128x256xf32>
    %37 = arith.subf %33, %36 : vector<128x256xf32>
    %38 = math.exp %37 : vector<128x256xf32>
    %c0_22 = arith.constant 0 : index
    %c0_23 = arith.constant 0 : index
    %39 = vector.load %arg7[%c0_22, %c0_23] : memref<3x256xf32, #tpu.memory_space<vmem>>, vector<3x256xf32>
    %40 = tpu.concatenate %15, %39 in 0 : vector<4x256xf32>, vector<3x256xf32> -> vector<7x256xf32>
    %cst_24 = arith.constant dense<0.000000e+00> : vector<7x128xf32>
    %41 = tpu.matmul %40, %38, %cst_24 {dimension_numbers = #tpu.dot_dimension_numbers<[1], [1], [0], [0], [0, 0, 1, 0], [], []>} : vector<7x256xf32>, vector<128x256xf32>, vector<7x128xf32> -> vector<7x128xf32>
    %42 = vector.extract_strided_slice %41 {offsets = [6, 0], sizes = [1, 128], strides = [1, 1]} : vector<7x128xf32> to vector<1x128xf32>
    %43 = tpu.reciprocal %42 : vector<1x128xf32> -> vector<1x128xf32>
    %44 = vector.extract_strided_slice %41 {offsets = [0, 0], sizes = [6, 128], strides = [1, 1]} : vector<7x128xf32> to vector<6x128xf32>
    %45 = vector.broadcast %43 : vector<1x128xf32> to vector<6x128xf32>
    %46 = arith.mulf %44, %45 : vector<6x128xf32>
    %47 = tpu.concatenate %13, %46, %43 in 0 : vector<4x128xf32>, vector<6x128xf32>, vector<1x128xf32> -> vector<11x128xf32>
    %c0_25 = arith.constant 0 : index
    %c0_26 = arith.constant 0 : index
    %c0_27 = arith.constant 0 : index
    %48 = vector.load %arg8[%c0_25, %c0_26, %c0_27] : memref<1x11x128xf32, #tpu.memory_space<vmem>>, vector<1x11x128xf32>
    %49 = vector.shape_cast %48 : vector<1x11x128xf32> to vector<11x128xf32>
    %50 = vector.shape_cast %47 : vector<11x128xf32> to vector<1x11x128xf32>
    tpu.vector_store %arg8[%c0_25, %c0_26, %c0_27], %50 {strides = array<i32>} : memref<1x11x128xf32, #tpu.memory_space<vmem>>, vector<1x11x128xf32>,
    return
  }
  func.func @transform_0(%arg0: i32, %arg1: i32) -> (i32, i32, i32) {
    %c0_i32 = arith.constant 0 : i32
    %c0_i32_0 = arith.constant 0 : i32
    return %arg0, %c0_i32, %arg1 : i32, i32, i32
  }
  func.func @transform_1(%arg0: i32, %arg1: i32) -> (i32, i32, i32) {
    %c0_i32 = arith.constant 0 : i32
    %c0_i32_0 = arith.constant 0 : i32
    %c0_i32_1 = arith.constant 0 : i32
    return %arg0, %c0_i32, %c0_i32_0 : i32, i32, i32
  }
  func.func @transform_2(%arg0: i32, %arg1: i32) -> (i32, i32) {
    %c0_i32 = arith.constant 0 : i32
    %c0_i32_0 = arith.constant 0 : i32
    %c0_i32_1 = arith.constant 0 : i32
    return %c0_i32, %c0_i32_0 : i32, i32
  }
  func.func @transform_3(%arg0: i32, %arg1: i32) -> (i32, i32) {
    %c0_i32 = arith.constant 0 : i32
    %c0_i32_0 = arith.constant 0 : i32
    %c0_i32_1 = arith.constant 0 : i32
    return %c0_i32, %c0_i32_0 : i32, i32
  }
  func.func @transform_4(%arg0: i32, %arg1: i32) -> (i32, i32) {
    %c0_i32 = arith.constant 0 : i32
    %c0_i32_0 = arith.constant 0 : i32
    %c0_i32_1 = arith.constant 0 : i32
    return %c0_i32, %c0_i32_0 : i32, i32
  }
  func.func @transform_5(%arg0: i32, %arg1: i32) -> (i32, i32) {
    %c0_i32 = arith.constant 0 : i32
    %c0_i32_0 = arith.constant 0 : i32
    %c0_i32_1 = arith.constant 0 : i32
    return %c0_i32, %c0_i32_0 : i32, i32
  }
  func.func @transform_6(%arg0: i32, %arg1: i32) -> (i32, i32, i32) {
    %c0_i32 = arith.constant 0 : i32
    %c0_i32_0 = arith.constant 0 : i32
    return %arg0, %c0_i32, %arg1 : i32, i32, i32
  }
}

</mosaic_0001>

<bundles_post_ra>
// kernel: tpu_custom_call.1
= control target key start
LH: loop header
LB: loop body
LE: loop exit
PB: predicated region body
PF: predicated region fallthrough
CT: control target
= control target key end

     0   :  { %s2375_s0 = inlined_call_operand.hbm [shape: f32[2,4,256], index: 0, kind: input, shape index: {}]   ;;  %s2376_s1 = inlined_call_operand.hbm [shape: f32[2,4,256], index: 1, kind: input, shape index: {}]   ;;  %s2377_s2 = inlined_call_operand.hbm [shape: f32[4,4], index: 2, kind: input, shape index: {}]   ;;  %s2378_s3 = inlined_call_operand.hbm [shape: f32[4,4], index: 3, kind: input, shape index: {}]   ;;  %s2379_s4 = inlined_call_operand.hbm [shape: f32[4,4], index: 4, kind: input, shape index: {}]   ;;  %s2380_s5 = inlined_call_operand.vmem [shape: f32[3,256], index: 5, kind: input, shape index: {}]   ;;  %s2381_s6 = inlined_call_operand.vmem [shape: f32[2,11,256], index: 6, kind: output, shape index: {}]  }
   0x1   :  { %2387 = sst [smem:[#allocation19_spill]] %s2377_s2 }
   0x2   :  { %2388 = sst [smem:[#allocation20_spill]] %s2378_s3 }
   0x3   :  { %2389 = sst [smem:[#allocation21_spill]] %s2379_s4 }
   0x4   :  { %2390 = sst [smem:[#allocation22_spill]] %s2381_s6 }
   0x5   :  { %11 = vsyncpa [#allocation3], 0 }
   0x6   :  { %13 = vsyncpa [#allocation3 + $0x1], 0 }
   0x7   :  { %14 = vsyncpa [#allocation5], 0 }
   0x8   :  { %16 = vsyncpa [#allocation5 + $0x1], 0 }
   0x9   :  { %17 = vsyncpa [#allocation8], 0  ;;  %s1912_s21 = smov 0   ;;  %s1914_s22 = smov 0  }
   0xa   :  { %s1916_s23 = smov 0   ;;  %s1918_s24 = smov 0  }
   0xb   :  { %s1920_s25 = smov 0   ;;  %s1922_s26 = smov 0  }
   0xc   :  { %s1924_s27 = smov 0   ;;  %s1926_s28 = smov 0  }
   0xd   :  { %s1928_s29 = smov 0   ;;  %s1930_s30 = smov 0  }
   0xe   :  { %s1932_s7 = smov 0  }
   0xf LB: > { %2391 = sst [smem:[#allocation15_spill]] %s1852_s27  ;;  %s1968_s8 = sadd.s32 4294967295, %s1868_s7   ;;  %s1868_s7 = sphi %s1932_s7, %s23_s7   ;;  %s1864_s30 = sphi %s1930_s30, %s2428_s30   ;;  %s1860_s29 = sphi %s1928_s29, %s2427_s29   ;;  %s1856_s28 = sphi %s1926_s28, %s2426_s28   ;;  %s1852_s27 = sphi %s1924_s27, %s2425_s27   ;;  %s1848_s26 = sphi %s1922_s26, %s2424_s26   ;;  %s1844_s25 = sphi %s1920_s25, %s2423_s25   ;;  %s1840_s24 = sphi %s1918_s24, %s2422_s24   ;;  %s1836_s23 = sphi %s1916_s23, %s2421_s23   ;;  %s1832_s22 = sphi %s1914_s22, %s2420_s22   ;;  %s1828_s21 = sphi %s1912_s21, %s2419_s21  }
  0x10   : > { %2392 = sst [smem:[#allocation16_spill]] %s1856_s28  ;;  %p1359_p0 = scmp.ge.s32.totalorder %s1868_s7, 1 }
  0x11   : > { %p2382_p1 = scmp.eq.s32.totalorder %s1968_s8, 0  ;;  %p206_p2 = scmp.lt.s32.totalorder %s1868_s7, 5 }
  0x12   : > { %s1870_s10 = smov [#allocation6]   ;;  %s1871_s12 = smov [#allocation7]  }
  0x13   : > { %p1973_p3 = pnand %p1359_p0, %p206_p2  ;;  %s219_s11 = sshll.u32 %s1870_s10, 4  ;;  %s220_s11 = int_to_ptr.vmem [resolvable:$true] %s219_s11 }
  0x14   : > { %s230_s13 = sshll.u32 %s1871_s12, 4  ;;  %s1872_s15 = smov [#allocation9]   ;;  %s231_s13 = int_to_ptr.vmem [resolvable:$true] %s230_s13 }
  0x15   : > { %s2393_s9 = scalar_select %p1973_p3, 1, 0 }
  0x16   : > { %p1441_p4 = pneg %p1973_p3  ;;  %s241_s16 = sshll.u32 %s1872_s15, 4  ;;  %s1985_s16 = int_to_ptr.vmem [resolvable:$true] %s241_s16 }
  0x17   : > { %s1643_s17 = scalar_lea.vmem %s220_s11, 64  ;;  %p1651_p10 = scmp.lt.s32.totalorder %s220_s11, %s220_s11 }
  0x18   : > { %p1981_p5 = pnand %p1441_p4, %p2382_p1  ;;  %p1644_p7 = scmp.ne.s32.totalorder %s220_s11, %s1643_s17 }
  0x19   : > { %p1652_p11 = scmp.lt.s32.totalorder %s1643_s17, %s1643_s17 }
  0x1a   : > { %p1634_p6 = pneg %p1981_p5 }
  0x1b   : > { %p1653_p12 = por %p1652_p11, %p1651_p10 }
  0x1c   : > { %p1646_p8 = pnand %p1644_p7, %p1634_p6 }
  0x1e   : > { %p1647_p9 = pneg %p1646_p8 }
  0x20   : > { %p1654_p13 = pnand %p1653_p12, %p1647_p9 }
  0x22   : > { %1657 = shalt.err (!%p1654_p13)
}
  0x23   : > { %s2395_s2 = sld [smem:[#allocation19_spill]]  ;;  %s1669_s20 = scalar_lea.vmem %s231_s13, 64 }
  0x24   : > { %p1670_p0 = scmp.ne.s32.totalorder %s231_s13, %s1669_s20  ;;  %p1677_p7 = scmp.lt.s32.totalorder %s231_s13, %s231_s13 }
  0x25   : > { %p1678_p8 = scmp.lt.s32.totalorder %s1669_s20, %s1669_s20 }
  0x26   : > { %p1672_p2 = pnand %p1670_p0, %p1634_p6 }
  0x27   : > { %p1679_p1 = por %p1678_p8, %p1677_p7 }
  0x28   : > { %p1673_p4 = pneg %p1672_p2 }
  0x29   : > { %1444 = dma.hbm_to_vmem [thread:$0]  (!%p1981_p5), %s2395_s2, 64, %s220_s11, [#allocation5]  }
  0x2a   : > { %p1680_p3 = pnand %p1679_p1, %p1673_p4 }
  0x2c   : > { %1683 = shalt.err (!%p1680_p3)
}
  0x2d   : > { %s2396_s3 = sld [smem:[#allocation20_spill]]  ;;  %s1695_s11 = scalar_lea.vmem %s1985_s16, 64 }
  0x2e   : > { %p1696_p9 = scmp.ne.s32.totalorder %s1985_s16, %s1695_s11  ;;  %p1703_p12 = scmp.lt.s32.totalorder %s1985_s16, %s1985_s16 }
  0x2f   : > { %p1704_p1 = scmp.lt.s32.totalorder %s1695_s11, %s1695_s11 }
  0x30   : > { %p1698_p10 = pnand %p1696_p9, %p1634_p6 }
  0x31   : > { %p1705_p3 = por %p1704_p1, %p1703_p12 }
  0x32   : > { %p1699_p11 = pneg %p1698_p10 }
  0x33   : > { %1447 = dma.hbm_to_vmem [thread:$0]  (!%p1981_p5), %s2396_s3, 64, %s231_s13, [#allocation8]  }
  0x34   : > { %p1706_p13 = pnand %p1705_p3, %p1699_p11 }
  0x36   : > { %1709 = shalt.err (!%p1706_p13)
}
  0x37   : > { %s2397_s4 = sld [smem:[#allocation21_spill]]  ;;  %s32_s13 = sadd.s32 1, %s1860_s29 }
  0x38   : > { %p33_p6 = scmp.ge.s32.totalorder %s32_s13, 2  ;;  %s35_s14 = sadd.s32 1, %s1864_s30 }
  0x39   : > { %s44_s18 = sadd.s32 1, %s1848_s26  ;;  %p51_p0 = scmp.ne.s32.totalorder %s1848_s26, %s1844_s25 }
  0x3a   : > { %s2430_s13 = smov (%p33_p6, %s32_s13), 0  ;;  %s2432_s14 = smov (!%p33_p6, %s35_s14), %s1864_s30 }
  0x3b   : > { %2398 = sst [smem:[#allocation17_spill]] %s2430_s13  ;;  %s40_s19 = ssub.s32 %s1860_s29, %s2430_s13 }
  0x3c   : > { %p2386_p2 = scmp.eq.s32.totalorder %s1868_s7, 0  ;;  %p37_p4 = scmp.ge.s32.totalorder %s2432_s14, 2 }
  0x3d   : > { %1450 = dma.hbm_to_vmem [thread:$0]  (!%p1981_p5), %s2397_s4, 64, %s1985_s16, [#allocation8]  }
  0x3e   : > { %p57_p7 = scmp.ne.s32.totalorder %s1844_s25, %s1840_s24  ;;  %p2033_p5 = por %p2386_p2, %p51_p0 }
  0x3f   : > { %p193_p8 = scmp.eq.s32.totalorder %s1968_s8, 3  ;;  %s2434_s14 = smov (%p37_p4, %s2432_s14), 0 }
  0x40   : > { %2400 = sst [smem:[#allocation18_spill]] %s2434_s14  ;;  %p2401_p9 = scmp.eq.s32.totalorder %s1968_s8, 0 }
  0x41   : > { %p2046_p11 = por %p193_p8, %p51_p0  ;;  %s2052_s24 = ssub.s32 %s1864_s30, %s2434_s14 }
  0x42   : > { %p2042_p10 = por %p2401_p9, %p57_p7  ;;  %p1461_p12 = scmp.lt.s32.totalorder %s1868_s7, 4 }
  0x43   : > { %s41_s12 = sor.u32 %s40_s19, %s2052_s24  ;;  %p68_p1 = scmp.eq.s32.totalorder %s2052_s24, 0 }
  0x44   : > { %p42_p3 = scmp.eq.s32.totalorder %s41_s12, 0  ;;  %s255_s11 = sand.u32 1, %s1848_s26  }
  0x45   : > { %s1364_s15 = sshll.u32 %s255_s11, 2  ;;  %s1365_s2 = sshll.u32 %s1864_s30, 1 }
  0x46   : > { %s2059_s17 = scalar_select %p42_p3, %s1848_s26, %s44_s18  }
  0x47   : > { %s264_s3 = sadd.s32 %s1860_s29, %s1365_s2  ;;  %s259_s4 = scalar_lea.vmem [#allocation2], %s1364_s15 }
  0x48   : > { %s268_s13 = sshll.u32 %s259_s4, 4  ;;  %s1366_s6 = sshll.u32 %s264_s3, 6  ;;  %s269_s13 = int_to_ptr.vmem [resolvable:$true] %s268_s13 }
  0x49   : > { %s266_s14 = scalar_lea.hbm %s2375_s0, %s1366_s6  ;;  %p2070_p13 = pnand %p1461_p12, %p2033_p5 }
  0x4a   : > { %s256_s12 = scalar_lea.sflag [#allocation3], %s255_s11  ;;  %s1723_s18 = scalar_lea.vmem %s269_s13, 64 }
  0x4b   : > { %p1712_p6 = pneg %p2070_p13  ;;  %p1724_p0 = scmp.ne.s32.totalorder %s269_s13, %s1723_s18 }
  0x4c   : > { %s1873_s2 = smov [#allocation2]  }
  0x4d   : > { %p1726_p4 = pnand %p1724_p0, %p1712_p6  ;;  %s1728_s3 = sshll.u32 %s1873_s2, 4  ;;  %s1729_s3 = int_to_ptr.vmem [resolvable:$false] %s1728_s3 }
  0x4e   : > { %s1730_s4 = scalar_lea.vmem %s1729_s3, 128  ;;  %p1731_p8 = scmp.lt.s32.totalorder %s269_s13, %s1729_s3 }
  0x4f   : > { %p1727_p7 = pneg %p1726_p4  ;;  %p1732_p9 = scmp.lt.s32.totalorder %s1730_s4, %s1723_s18 }
  0x51   : > { %p1733_p3 = por %p1732_p9, %p1731_p8 }
  0x53   : > { %p1734_p2 = pnand %p1733_p3, %p1727_p7 }
  0x55   : > { %1737 = shalt.err (!%p1734_p2)
}
  0x56   : > { %1454 = dma.hbm_to_vmem [thread:$0]  (!%p2070_p13), %s266_s14, 64, %s269_s13, %s256_s12  }
  0x57   : > { %s70_s6 = sadd.s32 1, %s1836_s23  ;;  %p77_p2 = scmp.ne.s32.totalorder %s1836_s23, %s1832_s22 }
  0x58   : > { %s2082_s27 = scalar_select %p68_p1, %s1836_s23, %s70_s6  }
  0x59   : > { %p83_p5 = scmp.ne.s32.totalorder %s1832_s22, %s1828_s21  ;;  %s275_s28 = sand.u32 1, %s1868_s7  }
  0x5a   : > { %s277_s16 = sand.u32 1, %s1836_s23   ;;  %p2405_p6 = scmp.eq.s32.totalorder %s1868_s7, 0 }
  0x5b   : > { %p2406_p4 = scmp.eq.s32.totalorder %s1968_s8, 0  ;;  %s1367_s15 = sshll.u32 %s277_s16, 3 }
  0x5c   : > { %p79_p0 = por %p77_p2, %p2405_p6  ;;  %s1410_s19 = sshll.u32 %s1864_s30, 7 }
  0x5d   : > { %p2094_p7 = por %p83_p5, %p2406_p4  ;;  %s285_s13 = scalar_lea.hbm %s2376_s1, %s1410_s19 }
  0x5e   : > { %s279_s14 = scalar_lea.vmem [#allocation4], %s1367_s15  ;;  %p2104_p1 = pnand %p1461_p12, %p79_p0 }
  0x5f   : > { %s287_s24 = sshll.u32 %s279_s14, 4  ;;  %s276_s12 = scalar_lea.sflag [#allocation5], %s275_s28  ;;  %s288_s24 = int_to_ptr.vmem [resolvable:$true] %s287_s24 }
  0x60   : > { %p1740_p13 = pneg %p2104_p1  ;;  %s1751_s3 = scalar_lea.vmem %s288_s24, 128 }
  0x61   : > { %p1752_p8 = scmp.ne.s32.totalorder %s288_s24, %s1751_s3  ;;  %s1874_s4 = smov [#allocation4]  }
  0x62   : > { %s1756_s6 = sshll.u32 %s1874_s4, 4  ;;  %s1757_s6 = int_to_ptr.vmem [resolvable:$false] %s1756_s6 }
  0x63   : > { %p1754_p9 = pnand %p1752_p8, %p1740_p13  ;;  %s1758_s16 = scalar_lea.vmem %s1757_s6, 256 }
  0x64   : > { %p1759_p2 = scmp.lt.s32.totalorder %s288_s24, %s1757_s6  ;;  %p1760_p5 = scmp.lt.s32.totalorder %s1758_s16, %s1751_s3 }
  0x65   : > { %p1755_p3 = pneg %p1754_p9 }
  0x66   : > { %p1761_p6 = por %p1760_p5, %p1759_p2 }
  0x68   : > { %p1762_p4 = pnand %p1761_p6, %p1755_p3 }
  0x6a   : > { %1765 = shalt.err (!%p1762_p4)
}
  0x6b   : > { %1457 = dma.hbm_to_vmem [thread:$0]  (!%p2104_p1), %s285_s13, 128, %s288_s24, %s276_s12  }
  0x6c   : > { %p2409_p12 = scmp.ne.s32.totalorder %s2393_s9, 0 }
  0x6d   : > { %s2115_s28 = sand.u32 (!%p2409_p12), 1, %s1844_s25  }
  0x6e   : > { %296 = sbr.rel (%p2409_p12) target bundleno = 1184 (0x4a0), region = 44  ;;  %s1371_s15 = sshll.u32 (!%p2409_p12), %s2115_s28, 2 }
  0x6f   : > { %s299_s19 = scalar_lea.sflag (!%p2409_p12), [#allocation3], %s2115_s28  ;;  %s302_s18 = scalar_lea.vmem (!%p2409_p12), [#allocation2], %s1371_s15 }
  0x73   : > { %1811 = dma.done.wait (%p2042_p10), %s299_s19, 64  }
  0x74   : > { %1813 = vsyncadd (%p2042_p10), %s299_s19, 4294967232  ;;  %s307_s2 = sand.u32 1, %s1968_s8   ;;  %s309_s9 = sand.u32 1, %s1832_s22  }
  0x75   : > { %s1372_s13 = sshll.u32 %s309_s9, 3  ;;  %s308_s14 = scalar_lea.sflag [#allocation5], %s307_s2 }
  0x76   : > { %s311_s24 = scalar_lea.vmem [#allocation4], %s1372_s13 }
  0x77   : > { %1815 = dma.done.wait (%p2094_p7), %s308_s14, 128  }
  0x78   : > { %1817 = vsyncadd (%p2094_p7), %s308_s14, 4294967168  ;;  %p2410_p0 = scmp.eq.s32.totalorder %s1968_s8, 0 }
  0x7a   : > { %1819 = dma.done.wait (%p2410_p0), [#allocation5], 64   ;;  %p2411_p1 = pmov %p2410_p0 }
  0x7b   : > { %p2412_p10 = pmov %p2410_p0 }
  0x7c   : > { %1821 = vsyncadd (%p2411_p1), [#allocation5], 4294967232 }
  0x7d   : > { %1823 = dma.done.wait (%p2412_p10), [#allocation8], 128   ;;  %p2413_p13 = pmov %p2410_p0 }
  0x7e   : > { %v1875_v0 = vmov 0.0   ;;  %vm1876_vm0 = vmmov 0   ;;  %vm365_vm1 = vcmask 1043456   ;;  %vm361_vm2 = vcmask 31744   ;;  %v2141_v1 = vld [vmem:[%s302_s18] sm:$0xf] }
  0x7f   : > { %1825 = vsyncadd (%p2413_p13), [#allocation8], 4294967168  ;;  %1415 = vmatprep.subr.mxu0 %v1875_v0  ;;  %1417 = vmatprep.mubr.msk.f32.mxu0 %vm1876_vm0, %v1875_v0  ;;  %v358_v2 = vld [vmem:[#allocation6] sm:$0xf]  ;;  %v2143_v3 = vld [vmem:[%s311_s24] sm:$0xff]  ;;  %s1376_s11 = sshll.u32 %s2115_s28, 4 }
  0x80   : > { %1420 = vmatprep.subr.mxu1 %v1875_v0  ;;  %1422 = vmatprep.mubr.msk.f32.mxu1 %vm1876_vm0, %v1875_v0  ;;  %v2149_v4 = vcombine.high %v2143_v3, %v2143_v3  ;;  %v360_v5 = vld [vmem:[#allocation7] sm:$0xf]  ;;  %v359_v62 = vld [vmem:[#allocation9] sm:$0xf]  ;;  %vm1177_vm3 = vcmask 1041408   ;;  %s355_s21 = scalar_lea.vmem [#allocation10], %s1376_s11 }
  0x81   : > { %1416 = vmatpush3.msk.msra.mxu0 %vm365_vm1, %v2141_v1  ;;  %1421 = vmatpush3.msk.msra.mxu1 %vm365_vm1, %v2141_v1  ;;  %s2414_s12 = sld [smem:[#allocation16_spill]] (%p2046_p11) }
  0x82   : > { %1418 = vmatmul.mubr.msk.f32.vlgmr.msra.gmra.mxu0 %vm361_vm2, %v358_v2  ;;  %1381 = vmatprep.subr.msk.mxu0 %vm365_vm1, %v2149_v4  ;;  %s2415_s3 = sld [smem:[#allocation15_spill]] (%p2046_p11) }
  0x83   : > { %586 = vmatprep.mubr.f32.mxu0 %v1875_v0  ;;  %1382 = vmatpush1.msk.msra.mxu0 %vm365_vm1, %v2143_v3  ;;  %s2416_s19 = sld [smem:[#allocation22_spill]] (%p2046_p11) }
  0x84   : > { %1384 = vmatprep.subr.msk.mxu1 %vm365_vm1, %v2149_v4  ;;  %1423 = vmatmul.mubr.msk.f32.vlgmr.msra.gmra.mxu1 %vm361_vm2, %v359_v62 }
  0x85   : > { %1385 = vmatpush1.msk.msra.mxu1 %vm365_vm1, %v2143_v3  ;;  %657 = vmatprep.mubr.f32.mxu1 %v1875_v0 }
  0x86   : > { %1383 = vmatmul.mubr.msk.f32.vlgmr.msra.gmra.mxu0 %vm361_vm2, %v360_v5 }
  0x87   : > { %847 = vmatprep.mubr.f32.mxu0 %v1875_v0  ;;  %s1406_s4 = sshll.u32 (%p2046_p11), %s2414_s12, 2 }
  0x88   : > { %1386 = vmatmul.mubr.msk.f32.vlgmr.msra.gmra.mxu1 %vm361_vm2, %v359_v62  ;;  %s1189_s6 = sadd.s32 (%p2046_p11), %s2415_s3, %s1406_s4 }
  0x89   : > { %s1407_s16 = sshll.u32 (%p2046_p11), %s1189_s6, 3 }
  0x8a   : > { %s1191_s18 = scalar_lea.vmem (%p2046_p11), %s2416_s19, %s1407_s16 }
 0x142   : > { %v435_v6 = vpop.f32.mrf.mxu0 }
 0x143   : > { %v436_v7 = vadd.f32 %v435_v6, %v2141_v1 }
 0x144   : > { %v1419_v8 = vpop.f32.mrf.mxu0 }
 0x145   : > { %v664_v9 = vmul.f32 %v436_v7, %v436_v7 }
 0x146   : > { %v588_v10 = vpop.f32.mrf.mxu0 }
 0x147   : > { %v665_v11 = vsel %vm365_vm1, %v664_v9, 0.0  ;;  %v589_v12 = vadd.f32 %v588_v10, %v2143_v3 }
 0x148   : > { %v666_v13 = vrot.slane %v665_v11, 4  ;;  %v590_v14 = vpop.f32.mrf.mxu0 }
 0x149   : > { %v675_v15 = vmul.f32 %v589_v12, %v589_v12  ;;  %v591_v16 = vadd.f32 %v590_v14, %v2149_v4 }
 0x14a   : > { %v667_v17 = vadd.f32 %v666_v13, %v665_v11 }
 0x14b   : > { %v677_v18 = vsel %vm365_vm1, %v675_v15, 0.0  ;;  %v676_v19 = vmul.f32 %v591_v16, %v591_v16 }
 0x14c   : > { %v668_v20 = vrot.slane %v667_v17, 2  ;;  %v678_v21 = vrot.slane %v677_v18, 4 }
 0x14d   : > { %v684_v22 = vsel %vm365_vm1, %v676_v19, 0.0 }
 0x14e   : > { %v669_v23 = vadd.f32 %v668_v20, %v667_v17  ;;  %v679_v24 = vadd.f32 %v678_v21, %v677_v18  ;;  %v685_v25 = vrot.slane %v684_v22, 4 }
 0x150   : > { %v670_v26 = vrot.slane %v669_v23, 1  ;;  %v680_v27 = vrot.slane %v679_v24, 2  ;;  %v686_v28 = vadd.f32 %v685_v25, %v684_v22 }
 0x152   : > { %v671_v29 = vadd.f32 %v670_v26, %v669_v23  ;;  %v681_v30 = vadd.f32 %v680_v27, %v679_v24  ;;  %v687_v31 = vrot.slane %v686_v28, 2 }
 0x154   : > { %v672_v32 = vmax.f32 %v671_v29, 1e-24  ;;  %v682_v33 = vrot.slane %v681_v30, 1  ;;  %v688_v34 = vadd.f32 %v687_v31, %v686_v28 }
 0x156   : > { %1560 = vrsqrt.f32 %v672_v32  ;;  %v683_v35 = vadd.f32 %v682_v33, %v681_v30  ;;  %v689_v36 = vrot.slane %v688_v34, 1 }
 0x158   : > { %v691_v37 = vmax.f32 %v683_v35, 1e-24  ;;  %v690_v38 = vadd.f32 %v689_v36, %v688_v34 }
 0x15a   : > { %1562 = vrsqrt.f32 %v691_v37  ;;  %v692_v39 = vmax.f32 %v690_v38, 1e-24 }
 0x15c   : > { %1564 = vrsqrt.f32 %v692_v39 }
 0x163   : > { %v1561_v40 = vpop.eup %1560 }
 0x164   : > { %v674_v41 = vmul.f32 %v1561_v40, %v436_v7 }
 0x166   : > { %697 = vxpose.xlu0.b32.start.end [1/1] (short) %v674_v41, 128 }
 0x167   : > { %v1563_v42 = vpop.eup %1562 }
 0x168   : > { %v695_v44 = vmul.f32 %v1563_v42, %v589_v12 }
 0x169   : > { %v1565_v43 = vpop.eup %1564 }
 0x16a   : > { %v696_v45 = vmul.f32 %v1565_v43, %v591_v16 }
 0x16c   : > { %1387 = vmatprep.subr.msk.mxu0 %vm365_vm1, %v696_v45 }
 0x16d   : > { %1388 = vmatpush1.msk.msra.mxu0 %vm365_vm1, %v695_v44 }
 0x1e2   : > { %v713_v46 = vpop.trf.xlu0 }
 0x1e3   : > { %1389 = vmatmul.mubr.msk.f32.vlgmr.msra.gmra.mxu0 %vm361_vm2, %v713_v46 }
 0x1e4   : > { %853 = vmatprep.mubr.f32.mxu0 %v1875_v0 }
 0x1e6   : > { %v714_v47 = vpop.trf.xlu0 }
 0x1e7   : > { %1390 = vmatmul.mubr.msk.f32.gmra.mxu0 %vm361_vm2, %v714_v47 }
 0x1e8   : > { %859 = vmatprep.mubr.f32.mxu0 %v1875_v0 }
 0x1ea   : > { %v715_v48 = vpop.trf.xlu0 }
 0x1eb   : > { %1391 = vmatmul.mubr.msk.f32.gmra.mxu0 %vm361_vm2, %v715_v48 }
 0x1ec   : > { %865 = vmatprep.mubr.f32.mxu0 %v1875_v0 }
 0x1ee   : > { %v716_v49 = vpop.trf.xlu0 }
 0x1ef   : > { %1392 = vmatmul.mubr.msk.f32.gmra.mxu0 %vm361_vm2, %v716_v49 }
 0x1f0   : > { %871 = vmatprep.mubr.f32.mxu0 %v1875_v0 }
 0x1f2   : > { %v717_v50 = vpop.trf.xlu0 }
 0x1f3   : > { %1393 = vmatmul.mubr.msk.f32.gmra.mxu0 %vm361_vm2, %v717_v50  ;;  %v2291_v50 = vpop.f32.mrf.mxu1 }
 0x1f4   : > { %877 = vmatprep.mubr.f32.mxu0 %v1875_v0 }
 0x1f6   : > { %v718_v51 = vpop.trf.xlu0 }
 0x1f7   : > { %1394 = vmatmul.mubr.msk.f32.gmra.mxu0 %vm361_vm2, %v718_v51  ;;  %v1424_v51 = vpop.f32.mrf.mxu1 }
 0x1f8   : > { %883 = vmatprep.mubr.f32.mxu0 %v1875_v0 }
 0x1fa   : > { %v719_v52 = vpop.trf.xlu0 }
 0x1fb   : > { %1395 = vmatmul.mubr.msk.f32.gmra.mxu0 %vm361_vm2, %v719_v52  ;;  %v659_v52 = vpop.f32.mrf.mxu1 }
 0x1fc   : > { %889 = vmatprep.mubr.f32.mxu0 %v1875_v0 }
 0x1fe   : > { %v720_v53 = vpop.trf.xlu0 }
 0x1ff   : > { %1396 = vmatmul.mubr.msk.f32.gmra.mxu0 %vm361_vm2, %v720_v53  ;;  %v660_v53 = vadd.f32 %v659_v52, %v2143_v3 }
 0x200   : > { %895 = vmatprep.mubr.f32.mxu0 %v1875_v0 }
 0x202   : > { %v721_v54 = vpop.trf.xlu0 }
 0x203   : > { %1397 = vmatmul.mubr.msk.f32.gmra.mxu0 %vm361_vm2, %v721_v54  ;;  %v661_v54 = vpop.f32.mrf.mxu1 }
 0x204   : > { %901 = vmatprep.mubr.f32.mxu0 %v1875_v0 }
 0x206   : > { %v722_v55 = vpop.trf.xlu0 }
 0x207   : > { %1398 = vmatmul.mubr.msk.f32.gmra.mxu0 %vm361_vm2, %v722_v55  ;;  %v662_v55 = vadd.f32 %v661_v54, %v2149_v4 }
 0x208   : > { %907 = vmatprep.mubr.f32.mxu0 %v1875_v0 }
 0x20a   : > { %v723_v56 = vpop.trf.xlu0 }
 0x20b   : > { %1399 = vmatmul.mubr.msk.f32.gmra.mxu0 %vm361_vm2, %v723_v56  ;;  %v1088_v56 = vld [vmem:[%s2380_s5] sm:$0x77] }
 0x20c   : > { %913 = vmatprep.mubr.f32.mxu0 %v1875_v0 }
 0x20e   : > { %v724_v57 = vpop.trf.xlu0 }
 0x20f   : > { %1400 = vmatmul.mubr.msk.f32.gmra.mxu0 %vm361_vm2, %v724_v57  ;;  %v1090_v57 = vcombine.low %v1088_v56, %v1088_v56 }
 0x210   : > { %919 = vmatprep.mubr.f32.mxu0 %v1875_v0 }
 0x212   : > { %v725_v58 = vpop.trf.xlu0 }
 0x213   : > { %1401 = vmatmul.mubr.msk.f32.gmra.mxu0 %vm361_vm2, %v725_v58  ;;  %v1093_v58 = vsel %vm365_vm1, %v662_v55, %v1088_v56 }
 0x214   : > { %925 = vmatprep.mubr.f32.mxu0 %v1875_v0  ;;  %1158 = vmatprep.mubr.f32.mxu1 %v1093_v58 }
 0x216   : > { %v726_v59 = vpop.trf.xlu0 }
 0x217   : > { %1402 = vmatmul.mubr.msk.f32.gmra.mxu0 %vm361_vm2, %v726_v59  ;;  %v2300_v59 = vsel %vm365_vm1, %v660_v53, %v1090_v57 }
 0x218   : > { %931 = vmatprep.mubr.f32.mxu0 %v1875_v0 }
 0x21a   : > { %v727_v60 = vpop.trf.xlu0 }
 0x21b   : > { %1403 = vmatmul.mubr.msk.f32.gmra.mxu0 %vm361_vm2, %v727_v60 }
 0x21c   : > { %937 = vmatprep.mubr.f32.mxu0 %v1875_v0 }
 0x21e   : > { %v728_v61 = vpop.trf.xlu0 }
 0x21f   : > { %1404 = vmatmul.mubr.msk.f32.gmra.mxu0 %vm361_vm2, %v728_v61 }
 0x2a3   : > { %v2207_v63 = vpop.f32.mrf.mxu0 }
 0x2a5   : > { %v2209_v2 = vpop.f32.mrf.mxu0 }
 0x2a6   : > { %v944_v49 = vmax.f32 %v2207_v63, %v2209_v2 }
 0x2a7   : > { %v2211_v5 = vpop.f32.mrf.mxu0 }
 0x2a9   : > { %v2213_v6 = vpop.f32.mrf.mxu0 }
 0x2aa   : > { %v947_v48 = vmax.f32 %v2211_v5, %v2213_v6 }
 0x2ab   : > { %v2215_v7 = vpop.f32.mrf.mxu0 }
 0x2ad   : > { %v2217_v8 = vpop.f32.mrf.mxu0 }
 0x2ae   : > { %v950_v47 = vmax.f32 %v2215_v7, %v2217_v8 }
 0x2af   : > { %v2219_v9 = vpop.f32.mrf.mxu0 }
 0x2b1   : > { %v2221_v10 = vpop.f32.mrf.mxu0 }
 0x2b2   : > { %v953_v46 = vmax.f32 %v2219_v9, %v2221_v10 }
 0x2b3   : > { %v2223_v11 = vpop.f32.mrf.mxu0 }
 0x2b5   : > { %v2225_v0 = vpop.f32.mrf.mxu0 }
 0x2b6   : > { %v956_v45 = vmax.f32 %v2223_v11, %v2225_v0 }
 0x2b7   : > { %v2227_v12 = vpop.f32.mrf.mxu0 }
 0x2b9   : > { %v2229_v13 = vpop.f32.mrf.mxu0 }
 0x2ba   : > { %v959_v44 = vmax.f32 %v2227_v12, %v2229_v13 }
 0x2bb   : > { %v2231_v14 = vpop.f32.mrf.mxu0 }
 0x2bd   : > { %v2233_v15 = vpop.f32.mrf.mxu0 }
 0x2be   : > { %v962_v43 = vmax.f32 %v2231_v14, %v2233_v15 }
 0x2bf   : > { %v2235_v16 = vpop.f32.mrf.mxu0 }
 0x2c1   : > { %v2237_v17 = vpop.f32.mrf.mxu0 }
 0x2c2   : > { %v965_v42 = vmax.f32 %v2235_v16, %v2237_v17 }
 0x2c3   : > { %v2239_v18 = vpop.f32.mrf.mxu0 }
 0x2c5   : > { %v2241_v19 = vpop.f32.mrf.mxu0 }
 0x2c6   : > { %v968_v41 = vmax.f32 %v2239_v18, %v2241_v19 }
 0x2c7   : > { %v2243_v20 = vpop.f32.mrf.mxu0 }
 0x2c9   : > { %v2245_v21 = vpop.f32.mrf.mxu0 }
 0x2ca   : > { %v971_v40 = vmax.f32 %v2243_v20, %v2245_v21 }
 0x2cb   : > { %v2247_v22 = vpop.f32.mrf.mxu0 }
 0x2cd   : > { %v2249_v23 = vpop.f32.mrf.mxu0 }
 0x2ce   : > { %v974_v39 = vmax.f32 %v2247_v22, %v2249_v23 }
 0x2cf   : > { %v2251_v24 = vpop.f32.mrf.mxu0 }
 0x2d1   : > { %v2253_v25 = vpop.f32.mrf.mxu0 }
 0x2d2   : > { %v977_v38 = vmax.f32 %v2251_v24, %v2253_v25 }
 0x2d3   : > { %v2255_v26 = vpop.f32.mrf.mxu0 }
 0x2d5   : > { %v2257_v27 = vpop.f32.mrf.mxu0 }
 0x2d6   : > { %v980_v37 = vmax.f32 %v2255_v26, %v2257_v27 }
 0x2d7   : > { %v2259_v28 = vpop.f32.mrf.mxu0 }
 0x2d9   : > { %v2261_v29 = vpop.f32.mrf.mxu0 }
 0x2da   : > { %v983_v36 = vmax.f32 %v2259_v28, %v2261_v29 }
 0x2db   : > { %v933_v30 = vpop.f32.mrf.mxu0 }
 0x2dd   : > { %v935_v31 = vpop.f32.mrf.mxu0 }
 0x2de   : > { %v986_v32 = vmax.f32 %v933_v30, %v935_v31 }
 0x2df   : > { %v939_v33 = vpop.f32.mrf.mxu0 }
 0x2e0   : > { %987 = vmax.xlane.f32.xlu1 %v986_v32 }
 0x2e1   : > { %v941_v34 = vpop.f32.mrf.mxu0 }
 0x2e2   : > { %v989_v35 = vmax.f32 %v939_v33, %v941_v34 }
 0x2e4   : > { %984 = vmax.xlane.f32.xlu1 %v983_v36  ;;  %990 = vmax.xlane.f32.xlu0 %v989_v35 }
 0x2e8   : > { %981 = vmax.xlane.f32.xlu1 %v980_v37 }
 0x2ec   : > { %978 = vmax.xlane.f32.xlu1 %v977_v38 }
 0x2f0   : > { %975 = vmax.xlane.f32.xlu1 %v974_v39 }
 0x2f4   : > { %972 = vmax.xlane.f32.xlu1 %v971_v40 }
 0x2f8   : > { %969 = vmax.xlane.f32.xlu1 %v968_v41 }
 0x2fc   : > { %966 = vmax.xlane.f32.xlu1 %v965_v42 }
 0x300   : > { %963 = vmax.xlane.f32.xlu1 %v962_v43 }
 0x304   : > { %960 = vmax.xlane.f32.xlu1 %v959_v44 }
 0x308   : > { %957 = vmax.xlane.f32.xlu1 %v956_v45 }
 0x30c   : > { %954 = vmax.xlane.f32.xlu1 %v953_v46 }
 0x310   : > { %951 = vmax.xlane.f32.xlu1 %v950_v47 }
 0x314   : > { %948 = vmax.xlane.f32.xlu1 %v947_v48 }
 0x318   : > { %945 = vmax.xlane.f32.xlu1 %v944_v49 }
 0x369   : > { %v988_v60 = vpop.xlane.xlu1 %987 }
 0x36a   : > { %v1021_v35 = vsub.f32 %v935_v31, %v988_v60  ;;  %v1020_v38 = vsub.f32 %v933_v30, %v988_v60 }
 0x36c   : > { %v1082_v39 = vmul.f32 1.442695, %v1021_v35  ;;  %v1080_v42 = vmul.f32 1.442695, %v1020_v38 }
 0x36d   : > { %v985_v61 = vpop.xlane.xlu1 %984  ;;  %v991_v62 = vpop.xlane.xlu0 %990 }
 0x36e   : > { %v1022_v32 = vsub.f32 %v939_v33, %v991_v62  ;;  %v1023_v3 = vsub.f32 %v941_v34, %v991_v62  ;;  %v1019_v40 = vsub.f32 %v2261_v29, %v985_v61  ;;  %v1018_v43 = vsub.f32 %v2259_v28, %v985_v61 }
 0x370   : > { %v1084_v36 = vmul.f32 1.442695, %v1022_v32  ;;  %v1086_v37 = vmul.f32 1.442695, %v1023_v3  ;;  %v1078_v44 = vmul.f32 1.442695, %v1019_v40 }
 0x371   : > { %v982_v4 = vpop.xlane.xlu1 %981  ;;  %v1076_v31 = vmul.f32 1.442695, %v1018_v43 }
 0x372   : > { %1566 = vpow2.f32 %v1084_v36  ;;  %v1017_v45 = vsub.f32 %v2257_v27, %v982_v4  ;;  %v1016_v34 = vsub.f32 %v2255_v26, %v982_v4 }
 0x373   : > { %1568 = vpow2.f32 %v1086_v37 }
 0x374   : > { %1570 = vpow2.f32 %v1082_v39  ;;  %v1074_v30 = vmul.f32 1.442695, %v1017_v45  ;;  %v1072_v47 = vmul.f32 1.442695, %v1016_v34 }
 0x375   : > { %v979_v41 = vpop.xlane.xlu1 %978  ;;  %1572 = vpow2.f32 %v1080_v42 }
 0x376   : > { %1574 = vpow2.f32 %v1078_v44  ;;  %v1015_v46 = vsub.f32 %v2253_v25, %v979_v41  ;;  %v1014_v48 = vsub.f32 %v2251_v24, %v979_v41 }
 0x377   : > { %1576 = vpow2.f32 %v1076_v31 }
 0x378   : > { %1578 = vpow2.f32 %v1074_v30  ;;  %v1070_v28 = vmul.f32 1.442695, %v1015_v46  ;;  %v1068_v53 = vmul.f32 1.442695, %v1014_v48 }
 0x379   : > { %v976_v33 = vpop.xlane.xlu1 %975  ;;  %1580 = vpow2.f32 %v1072_v47 }
 0x37a   : > { %v1013_v49 = vsub.f32 %v2249_v23, %v976_v33  ;;  %v1012_v26 = vsub.f32 %v2247_v22, %v976_v33  ;;  %1582 = vpow2.f32 %v1070_v28 }
 0x37b   : > { %1584 = vpow2.f32 %v1068_v53 }
 0x37c   : > { %v1066_v54 = vmul.f32 1.442695, %v1013_v49  ;;  %v1064_v56 = vmul.f32 1.442695, %v1012_v26 }
 0x37d   : > { %v973_v29 = vpop.xlane.xlu1 %972 }
 0x37e   : > { %v1011_v25 = vsub.f32 %v2245_v21, %v973_v29  ;;  %v1010_v23 = vsub.f32 %v2243_v20, %v973_v29  ;;  %1586 = vpow2.f32 %v1066_v54 }
 0x37f   : > { %v1567_v51 = vpop.eup %1566  ;;  %1588 = vpow2.f32 %v1064_v56 }
 0x380   : > { %v1569_v52 = vpop.eup %1568  ;;  %v1062_v58 = vmul.f32 1.442695, %v1011_v25  ;;  %v1060_v21 = vmul.f32 1.442695, %v1010_v23 }
 0x381   : > { %v970_v27 = vpop.xlane.xlu1 %969  ;;  %1094 = vmatprep.subr.mxu1 %v1569_v52  ;;  %v1571_v55 = vpop.eup %1570 }
 0x382   : > { %1095 = vmatpush1.xpose.msra.mxu1 %v1567_v51  ;;  %v1573_v57 = vpop.eup %1572  ;;  %v1009_v60 = vsub.f32 %v2241_v19, %v970_v27  ;;  %v1008_v62 = vsub.f32 %v2239_v18, %v970_v27  ;;  %1590 = vpow2.f32 %v1062_v58 }
 0x383   : > { %1096 = vmatprep.subr.mxu1 %v1571_v55  ;;  %v1575_v61 = vpop.eup %1574  ;;  %1592 = vpow2.f32 %v1060_v21 }
 0x384   : > { %v1577_v32 = vpop.eup %1576  ;;  %v1058_v35 = vmul.f32 1.442695, %v1009_v60  ;;  %v1056_v37 = vmul.f32 1.442695, %v1008_v62 }
 0x385   : > { %v967_v24 = vpop.xlane.xlu1 %966  ;;  %v1579_v36 = vpop.eup %1578 }
 0x386   : > { %1097 = vmatpush1.xpose.msra.mxu1 %v1573_v57  ;;  %v1007_v3 = vsub.f32 %v2237_v17, %v967_v24  ;;  %v1006_v19 = vsub.f32 %v2235_v16, %v967_v24  ;;  %v1581_v4 = vpop.eup %1580  ;;  %1594 = vpow2.f32 %v1058_v35 }
 0x387   : > { %1098 = vmatprep.subr.mxu1 %v1575_v61  ;;  %v1583_v40 = vpop.eup %1582  ;;  %1596 = vpow2.f32 %v1056_v37 }
 0x388   : > { %v1054_v38 = vmul.f32 1.442695, %v1007_v3  ;;  %v1052_v41 = vmul.f32 1.442695, %v1006_v19  ;;  %v1585_v42 = vpop.eup %1584 }
 0x389   : > { %v964_v22 = vpop.xlane.xlu1 %963 }
 0x38a   : > { %1099 = vmatpush1.xpose.msra.mxu1 %v1577_v32  ;;  %v1005_v39 = vsub.f32 %v2233_v15, %v964_v22  ;;  %v1004_v17 = vsub.f32 %v2231_v14, %v964_v22  ;;  %1598 = vpow2.f32 %v1054_v38  ;;  %v1165_v38 = vlaneseq }
 0x38b   : > { %1100 = vmatprep.subr.mxu1 %v1579_v36  ;;  %v1587_v45 = vpop.eup %1586  ;;  %1600 = vpow2.f32 %v1052_v41 }
 0x38c   : > { %v1050_v43 = vmul.f32 1.442695, %v1005_v39  ;;  %v1048_v33 = vmul.f32 1.442695, %v1004_v17  ;;  %v1589_v31 = vpop.eup %1588  ;;  %v1166_v39 = vshrl.u32 %v1165_v38, 7 }
 0x38d   : > { %v961_v20 = vpop.xlane.xlu1 %960 }
 0x38e   : > { %1101 = vmatpush1.xpose.msra.mxu1 %v1581_v4  ;;  %v1003_v44 = vsub.f32 %v2229_v13, %v961_v20  ;;  %v1002_v15 = vsub.f32 %v2227_v12, %v961_v20  ;;  %1602 = vpow2.f32 %v1050_v43 }
 0x38f   : > { %1102 = vmatprep.subr.mxu1 %v1583_v40  ;;  %v1591_v46 = vpop.eup %1590  ;;  %1604 = vpow2.f32 %v1048_v33  ;;  %v1167_v40 = vsub.s32 6, %v1166_v39 }
 0x390   : > { %v1046_v34 = vmul.f32 1.442695, %v1003_v44  ;;  %v1044_v29 = vmul.f32 1.442695, %v1002_v15  ;;  %v1593_v47 = vpop.eup %1592 }
 0x391   : > { %v958_v18 = vpop.xlane.xlu1 %957 }
 0x392   : > { %1103 = vmatpush1.xpose.msra.mxu1 %v1585_v42  ;;  %v1001_v30 = vsub.f32 %v2225_v0, %v958_v18  ;;  %v1000_v13 = vsub.f32 %v2223_v11, %v958_v18  ;;  %1606 = vpow2.f32 %v1046_v34  ;;  %v509_v42 = vadd.f32 %v2291_v50, %v2141_v1 }
 0x393   : > { %1104 = vmatprep.subr.mxu1 %v1587_v45  ;;  %v1595_v49 = vpop.eup %1594  ;;  %1608 = vpow2.f32 %v1044_v29 }
 0x394   : > { %v1042_v48 = vmul.f32 1.442695, %v1001_v30  ;;  %v1040_v12 = vmul.f32 1.442695, %v1000_v13  ;;  %v1597_v27 = vpop.eup %1596 }
 0x395   : > { %v955_v16 = vpop.xlane.xlu1 %954 }
 0x396   : > { %1105 = vmatpush1.xpose.msra.mxu1 %v1589_v31  ;;  %v999_v28 = vsub.f32 %v2221_v10, %v955_v16  ;;  %v998_v0 = vsub.f32 %v2219_v9, %v955_v16  ;;  %1610 = vpow2.f32 %v1042_v48 }
 0x397   : > { %1106 = vmatprep.subr.mxu1 %v1591_v46  ;;  %v1599_v26 = vpop.eup %1598  ;;  %1612 = vpow2.f32 %v1040_v12 }
 0x398   : > { %v1038_v52 = vmul.f32 1.442695, %v999_v28  ;;  %v1036_v11 = vmul.f32 1.442695, %v998_v0  ;;  %v1601_v54 = vpop.eup %1600 }
 0x399   : > { %v952_v14 = vpop.xlane.xlu1 %951 }
 0x39a   : > { %1107 = vmatpush1.xpose.msra.mxu1 %v1593_v47  ;;  %v997_v53 = vsub.f32 %v2217_v8, %v952_v14  ;;  %v996_v10 = vsub.f32 %v2215_v7, %v952_v14  ;;  %1614 = vpow2.f32 %v1038_v52 }
 0x39b   : > { %1108 = vmatprep.subr.mxu1 %v1595_v49  ;;  %v1603_v24 = vpop.eup %1602  ;;  %1616 = vpow2.f32 %v1036_v11 }
 0x39c   : > { %v1034_v25 = vmul.f32 1.442695, %v997_v53  ;;  %v1032_v56 = vmul.f32 1.442695, %v996_v10  ;;  %v1605_v23 = vpop.eup %1604 }
 0x39d   : > { %v949_v51 = vpop.xlane.xlu1 %948 }
 0x39e   : > { %1109 = vmatpush1.xpose.msra.mxu1 %v1597_v27  ;;  %v995_v55 = vsub.f32 %v2213_v6, %v949_v51  ;;  %v994_v8 = vsub.f32 %v2211_v5, %v949_v51  ;;  %1618 = vpow2.f32 %v1034_v25 }
 0x39f   : > { %1110 = vmatprep.subr.mxu1 %v1599_v26  ;;  %v1607_v60 = vpop.eup %1606  ;;  %1620 = vpow2.f32 %v1032_v56 }
 0x3a0   : > { %v1030_v57 = vmul.f32 1.442695, %v995_v55  ;;  %v1028_v7 = vmul.f32 1.442695, %v994_v8  ;;  %v1609_v61 = vpop.eup %1608 }
 0x3a1   : > { %v946_v9 = vpop.xlane.xlu1 %945 }
 0x3a2   : > { %1111 = vmatpush1.xpose.msra.mxu1 %v1601_v54  ;;  %v993_v58 = vsub.f32 %v2209_v2, %v946_v9  ;;  %v992_v6 = vsub.f32 %v2207_v63, %v946_v9  ;;  %1622 = vpow2.f32 %v1030_v57 }
 0x3a3   : > { %1112 = vmatprep.subr.mxu1 %v1603_v24  ;;  %v1611_v21 = vpop.eup %1610  ;;  %1624 = vpow2.f32 %v1028_v7 }
 0x3a4   : > { %v1026_v22 = vmul.f32 1.442695, %v993_v58  ;;  %v1024_v5 = vmul.f32 1.442695, %v992_v6  ;;  %v1613_v62 = vpop.eup %1612 }
 0x3a6   : > { %1113 = vmatpush1.xpose.msra.mxu1 %v1605_v23  ;;  %1626 = vpow2.f32 %v1026_v22 }
 0x3a7   : > { %1114 = vmatprep.subr.mxu1 %v1607_v60  ;;  %v1615_v32 = vpop.eup %1614  ;;  %1628 = vpow2.f32 %v1024_v5 }
 0x3a8   : > { %v1617_v2 = vpop.eup %1616 }
 0x3aa   : > { %1115 = vmatpush1.xpose.msra.mxu1 %v1609_v61 }
 0x3ab   : > { %1116 = vmatprep.subr.mxu1 %v1611_v21  ;;  %v1619_v35 = vpop.eup %1618 }
 0x3ac   : > { %v1621_v3 = vpop.eup %1620 }
 0x3ae   : > { %1117 = vmatpush1.xpose.msra.mxu1 %v1613_v62 }
 0x3af   : > { %1118 = vmatprep.subr.mxu1 %v1615_v32  ;;  %v1623_v63 = vpop.eup %1622 }
 0x3b0   : > { %v1625_v36 = vpop.eup %1624 }
 0x3b2   : > { %1119 = vmatpush1.xpose.msra.mxu1 %v1617_v2 }
 0x3b3   : > { %1120 = vmatprep.subr.mxu1 %v1619_v35  ;;  %v1627_v20 = vpop.eup %1626 }
 0x3b4   : > { %v1629_v37 = vpop.eup %1628 }
 0x3b6   : > { %1121 = vmatpush1.xpose.msra.mxu1 %v1621_v3 }
 0x3b7   : > { %1122 = vmatprep.subr.mxu1 %v1623_v63 }
 0x3ba   : > { %1123 = vmatpush1.xpose.msra.mxu1 %v1625_v36 }
 0x3bb   : > { %1124 = vmatprep.subr.mxu1 %v1627_v20 }
 0x3be   : > { %1125 = vmatpush1.xpose.msra.mxu1 %v1629_v37 }
 0x3c1   : > { %1159 = vmatmul.mubr.f32.vlgmr.msra.gmra.mxu1 %v2300_v59 }
 0x481   : > { %v1160_v19 = vpop.f32.mrf.mxu1 }
 0x482   : > { %1630 = vrcp.f32 %v1160_v19 }
 0x483   : > { %v1162_v4 = vpop.f32.mrf.mxu1 }
 0x48f   : > { %v1631_v18 = vpop.eup %1630 }
 0x490   : > { %v1168_v41 = vrot.slane %v1631_v18, %v1167_v40  ;;  %v1174_v44 = vrot.slane %v1631_v18, 4 }
 0x492   : > { %v1169_v17 = vmul.f32 %v1168_v41, %v1160_v19 }
 0x493   : > { %1187 = sbr.rel (!%p2046_p11) target bundleno = 1184 (0x4a0), region = 68 }
 0x494   : > { %v1171_v43 = vrot.slane %v1169_v17, 4 }
 0x496   : > { %v1176_v45 = vsel %vm365_vm1, %v509_v42, %v1171_v43  ;;  %v1178_v16 = vsel %vm1177_vm3, %v1171_v43, %v1174_v44 }
 0x497   : > { %1179 = vst [vmem:[%s355_s21] sm:$0xff] %v1176_v45  ;;  %1180 = vst [vmem:[%s355_s21 + $0x8] sm:$0x7] %v1178_v16 }
 0x49e   : > { %v1222_v59 = vld [vmem:[%s355_s21] sm:$0xff]  ;;  %v1224_v33 = vld [vmem:[%s355_s21 + $0x8] sm:$0xff] }
 0x49f   : > { %1223 = vst [vmem:[%s1191_s18] sm:$0xff] %v1222_v59  ;;  %1225 = vst [vmem:[%s1191_s18 + $0x10] sm:$0xff] %v1224_v33 }
 0x4a0 PF: > { %s23_s7 = sadd.s32 1, %s1868_s7   ;;  %s2417_s10 = sld [smem:[#allocation17_spill]] }
 0x4a1   : > { %p20_p7 = scmp.ge.s32.totalorder %s23_s7, 6   ;;  %s2418_s2 = sld [smem:[#allocation18_spill]] }
 0x4a2   : > { %s2419_s21 = smov %s1832_s22  ;;  %s2420_s22 = smov %s1836_s23 }
 0x4a3   : > { %s2421_s23 = smov %s2082_s27  ;;  %s2422_s24 = smov %s1844_s25 }
 0x4a4   : > { %s2423_s25 = smov %s1848_s26  ;;  %s2424_s26 = smov %s2059_s17 }
 0x4a5   : > { %s2425_s27 = smov %s1860_s29  ;;  %s2426_s28 = smov %s1864_s30 }
 0x4a6   : > { %s2427_s29 = smov %s2417_s10  ;;  %22 = sbr.rel (!%p20_p7) target bundleno = 15 (0xf), region = 147 }
 0x4a7   : > { %s2428_s30 = smov %s2418_s2 }
 0x4ab   :  { %1241 = vsyncpa [#allocation3], 1 }
 0x4ac   :  { %1243 = vsyncpa [#allocation3 + $0x1], 1 }
 0x4ad   :  { %1244 = vsyncpa [#allocation5], 1 }
 0x4ae   :  { %1246 = vsyncpa [#allocation5 + $0x1], 1 }
 0x4af   :  { %1247 = vsyncpa [#allocation8], 1 }

</bundles_post_ra>
